<compile_context>
chip_gen: v6e
topology: v6e:2x2x1
jax: 0.10.0
libtpu: 0.0.40
codegen_flags: <defaults>
</compile_context>

<pallas_src>
import jax
import jax.numpy as jnp
from jax.experimental import pallas as pl
from jax.experimental.pallas import tpu as pltpu

IN_FEATURES = 28 * 28   # 784
K_PAD = 896             # 7 * 128, lane-aligned contraction dim
HIDDEN = 128
OUT_FEATURES = 10
N_PAD = 128             # lane-padded fc2 output dim


def mlp_kernel(x_ref, w1_ref, b1_ref, w2_ref, b2_ref, o_ref):
    # fc1: (TB, 896)bf16 @ (896, 128)bf16 -> f32 acc, + bias, ReLU (f32, VPU)
    h = jnp.dot(x_ref[...], w1_ref[...], preferred_element_type=jnp.float32)
    h = jnp.maximum(h + b1_ref[...], 0.0)
    # fc2: (TB, 128)bf16 @ (128, 128)bf16 -> f32 acc, + bias.
    # 128-wide output -> unmasked lane-dense stores.
    out = jnp.dot(h.astype(jnp.bfloat16), w2_ref[...],
                  preferred_element_type=jnp.float32)
    o_ref[...] = (out + b2_ref[...]).astype(o_ref.dtype)


def _round_up(x, m):
    return ((x + m - 1) // m) * m


def nn_forward(x_nchw, w1, b1, w2, b2, *, tb=512):
    """Forward pass of the PyTorch NN module.

    x_nchw: (B, 1, 28, 28) f32
    w1: (784, 128) f32, b1: (128,) f32   (already transposed vs torch)
    w2: (128, 10)  f32, b2: (10,)  f32
    Returns (B, 10) f32.
    """
    B = x_nchw.shape[0]
    x2d = x_nchw.reshape(B, -1).astype(jnp.float32)   # torch.flatten(X, 1)

    # Batch tile: multiple of 8 sublanes, capped at `tb` (sized for v7x VMEM).
    TB = min(tb, _round_up(B, 8))
    Bp = _round_up(B, TB)
    grid = (Bp // TB,)

    # Pad + cast operands for the MXU (bf16 inputs, f32 accumulation).
    x_p = jnp.zeros((Bp, K_PAD), jnp.bfloat16).at[:B, :IN_FEATURES].set(
        x2d.astype(jnp.bfloat16))
    w1_p = jnp.zeros((K_PAD, HIDDEN), jnp.bfloat16).at[:IN_FEATURES, :].set(
        w1.astype(jnp.bfloat16))
    b1_p = b1.reshape(1, HIDDEN).astype(jnp.float32)
    w2_p = jnp.zeros((HIDDEN, N_PAD), jnp.bfloat16).at[:, :OUT_FEATURES].set(
        w2.astype(jnp.bfloat16))
    b2_p = jnp.zeros((1, N_PAD), jnp.float32).at[0, :OUT_FEATURES].set(
        b2.reshape(-1).astype(jnp.float32))

    cost = pl.CostEstimate(
        flops=2 * Bp * (K_PAD * HIDDEN + HIDDEN * N_PAD),
        transcendentals=0,
        bytes_accessed=(x_p.size * 2 + w1_p.size * 2 + w2_p.size * 2
                        + b1_p.size * 4 + b2_p.size * 4 + Bp * N_PAD * 4),
    )

    out_p = pl.pallas_call(
        mlp_kernel,
        out_shape=jax.ShapeDtypeStruct((Bp, N_PAD), jnp.float32),
        grid=grid,
        in_specs=[
            pl.BlockSpec((TB, K_PAD), lambda i: (i, 0)),       # x tile
            pl.BlockSpec((K_PAD, HIDDEN), lambda i: (0, 0)),   # W1 resident
            pl.BlockSpec((1, HIDDEN), lambda i: (0, 0)),       # b1 resident
            pl.BlockSpec((HIDDEN, N_PAD), lambda i: (0, 0)),   # W2 resident
            pl.BlockSpec((1, N_PAD), lambda i: (0, 0)),        # b2 resident
        ],
        out_specs=pl.BlockSpec((TB, N_PAD), lambda i: (i, 0)),
        compiler_params=pltpu.CompilerParams(
            dimension_semantics=("parallel",),
        ),
        cost_estimate=cost,
    )(x_p, w1_p, b1_p, w2_p, b2_p)

    # Padded batch rows / padded output lanes are garbage -> slice them off.
    return out_p[:B, :OUT_FEATURES]


def init_params(key):
    # Deterministic init mimicking nn.Linear default (uniform +/- 1/sqrt(fan_in)).
    k1, k2, k3, k4 = jax.random.split(key, 4)
    fan1 = IN_FEATURES
    fan2 = HIDDEN
    lim1 = 1.0 / jnp.sqrt(fan1)
    lim2 = 1.0 / jnp.sqrt(fan2)
    # Stored transposed relative to torch: (in_features, out_features).
    w1 = jax.random.uniform(k1, (fan1, HIDDEN), jnp.float32, -lim1, lim1)
    b1 = jax.random.uniform(k2, (HIDDEN,), jnp.float32, -lim1, lim1)
    w2 = jax.random.uniform(k3, (fan2, OUT_FEATURES), jnp.float32, -lim2, lim2)
    b2 = jax.random.uniform(k4, (OUT_FEATURES,), jnp.float32, -lim2, lim2)
    return w1, b1, w2, b2


if __name__ == "__main__":
    key = jax.random.PRNGKey(0)
    kx, kp = jax.random.split(key)
    B = 2
    x = jax.random.normal(kx, (B, 1, 28, 28), jnp.float32)  # MNIST-like NCHW
    w1, b1, w2, b2 = init_params(kp)

    out = jax.block_until_ready(nn_forward(x, w1, b1, w2, b2))
    assert out.shape == (B, OUT_FEATURES)

    # Reference with the same bf16-input / f32-accumulation math as the kernel.
    x2d = x.reshape(B, -1)
    h_ref = jnp.dot(x2d.astype(jnp.bfloat16), w1.astype(jnp.bfloat16),
                    preferred_element_type=jnp.float32) + b1.reshape(1, -1)
    h_ref = jnp.maximum(h_ref, 0.0)
    ref_bf16 = jnp.dot(h_ref.astype(jnp.bfloat16), w2.astype(jnp.bfloat16),
                       preferred_element_type=jnp.float32) + b2.reshape(1, -1)
    assert jnp.allclose(out, ref_bf16, atol=1e-3, rtol=1e-3)

    # Loose sanity check against the pure-f32 forward (bf16 rounding tolerance).
    ref_f32 = jnp.maximum(x2d @ w1 + b1.reshape(1, -1), 0.0) @ w2 + b2.reshape(1, -1)
    assert jnp.allclose(out, ref_f32, atol=5e-2, rtol=5e-2)

    print("KERNEL_OK")
</pallas_src>

<mosaic_0001>
module attributes {stable_mosaic.version = 11 : i64} {
  func.func @mlp_kernel(%arg0: i32, %arg1: memref<8x896xbf16, #tpu.memory_space<vmem>>, %arg2: memref<896x128xbf16, #tpu.memory_space<vmem>>, %arg3: memref<1x128xf32, #tpu.memory_space<vmem>>, %arg4: memref<128x128xbf16, #tpu.memory_space<vmem>>, %arg5: memref<1x128xf32, #tpu.memory_space<vmem>>, %arg6: memref<8x128xf32, #tpu.memory_space<vmem>>) attributes {dimension_semantics = [#tpu.dimension_semantics<parallel>], iteration_bounds = array<i64: 1>, scalar_prefetch = 0 : i64, scratch_operands = 0 : i64, tpu.core_type = #tpu.core_type<tc>, window_params = [{transform_indices = @transform_0, window_bounds = array<i64: 8, 896>}, {pipeline_mode = #tpu.pipeline_mode<synchronous>, transform_indices = @transform_1, window_bounds = array<i64: 896, 128>}, {pipeline_mode = #tpu.pipeline_mode<synchronous>, transform_indices = @transform_2, window_bounds = array<i64: 1, 128>}, {pipeline_mode = #tpu.pipeline_mode<synchronous>, transform_indices = @transform_3, window_bounds = array<i64: 128, 128>}, {pipeline_mode = #tpu.pipeline_mode<synchronous>, transform_indices = @transform_4, window_bounds = array<i64: 1, 128>}, {transform_indices = @transform_5, window_bounds = array<i64: 8, 128>}]} {
    %c0 = arith.constant 0 : index
    %c0_0 = arith.constant 0 : index
    %0 = vector.load %arg1[%c0, %c0_0] : memref<8x896xbf16, #tpu.memory_space<vmem>>, vector<8x896xbf16>
    %c0_1 = arith.constant 0 : index
    %c0_2 = arith.constant 0 : index
    %1 = vector.load %arg2[%c0_1, %c0_2] : memref<896x128xbf16, #tpu.memory_space<vmem>>, vector<896x128xbf16>
    %cst = arith.constant dense<0.000000e+00> : vector<8x128xf32>
    %2 = tpu.matmul %0, %1, %cst {dimension_numbers = #tpu.dot_dimension_numbers<[1], [0], [0], [1], [0, 0, 1, 1], [], []>} : vector<8x896xbf16>, vector<896x128xbf16>, vector<8x128xf32> -> vector<8x128xf32>
    %c0_3 = arith.constant 0 : index
    %c0_4 = arith.constant 0 : index
    %3 = vector.load %arg3[%c0_3, %c0_4] : memref<1x128xf32, #tpu.memory_space<vmem>>, vector<1x128xf32>
    %4 = vector.broadcast %3 : vector<1x128xf32> to vector<8x128xf32>
    %5 = arith.addf %2, %4 : vector<8x128xf32>
    %cst_5 = arith.constant 0.000000e+00 : f32
    %6 = vector.broadcast %cst_5 : f32 to vector<8x128xf32>
    %7 = arith.maximumf %5, %6 : vector<8x128xf32>
    %8 = arith.truncf %7 : vector<8x128xf32> to vector<8x128xbf16>
    %c0_6 = arith.constant 0 : index
    %c0_7 = arith.constant 0 : index
    %9 = vector.load %arg4[%c0_6, %c0_7] : memref<128x128xbf16, #tpu.memory_space<vmem>>, vector<128x128xbf16>
    %cst_8 = arith.constant dense<0.000000e+00> : vector<8x128xf32>
    %10 = tpu.matmul %8, %9, %cst_8 {dimension_numbers = #tpu.dot_dimension_numbers<[1], [0], [0], [1], [0, 0, 1, 1], [], []>} : vector<8x128xbf16>, vector<128x128xbf16>, vector<8x128xf32> -> vector<8x128xf32>
    %c0_9 = arith.constant 0 : index
    %c0_10 = arith.constant 0 : index
    %11 = vector.load %arg5[%c0_9, %c0_10] : memref<1x128xf32, #tpu.memory_space<vmem>>, vector<1x128xf32>
    %12 = vector.broadcast %11 : vector<1x128xf32> to vector<8x128xf32>
    %13 = arith.addf %10, %12 : vector<8x128xf32>
    %c0_11 = arith.constant 0 : index
    %c0_12 = arith.constant 0 : index
    %14 = vector.load %arg6[%c0_11, %c0_12] : memref<8x128xf32, #tpu.memory_space<vmem>>, vector<8x128xf32>
    tpu.vector_store %arg6[%c0_11, %c0_12], %13 {strides = array<i32>} : memref<8x128xf32, #tpu.memory_space<vmem>>, vector<8x128xf32>,
    return
  }
  func.func @transform_0(%arg0: i32) -> (i32, i32) {
    %c0_i32 = arith.constant 0 : i32
    %c0_i32_0 = arith.constant 0 : i32
    return %arg0, %c0_i32 : i32, i32
  }
  func.func @transform_1(%arg0: i32) -> (i32, i32) {
    %c0_i32 = arith.constant 0 : i32
    %c0_i32_0 = arith.constant 0 : i32
    %c0_i32_1 = arith.constant 0 : i32
    return %c0_i32, %c0_i32_0 : i32, i32
  }
  func.func @transform_2(%arg0: i32) -> (i32, i32) {
    %c0_i32 = arith.constant 0 : i32
    %c0_i32_0 = arith.constant 0 : i32
    %c0_i32_1 = arith.constant 0 : i32
    return %c0_i32, %c0_i32_0 : i32, i32
  }
  func.func @transform_3(%arg0: i32) -> (i32, i32) {
    %c0_i32 = arith.constant 0 : i32
    %c0_i32_0 = arith.constant 0 : i32
    %c0_i32_1 = arith.constant 0 : i32
    return %c0_i32, %c0_i32_0 : i32, i32
  }
  func.func @transform_4(%arg0: i32) -> (i32, i32) {
    %c0_i32 = arith.constant 0 : i32
    %c0_i32_0 = arith.constant 0 : i32
    %c0_i32_1 = arith.constant 0 : i32
    return %c0_i32, %c0_i32_0 : i32, i32
  }
  func.func @transform_5(%arg0: i32) -> (i32, i32) {
    %c0_i32 = arith.constant 0 : i32
    %c0_i32_0 = arith.constant 0 : i32
    return %arg0, %c0_i32 : i32, i32
  }
}

</mosaic_0001>

<bundles_post_ra>
// kernel: tpu_custom_call.1
= control target key start
LH: loop header
LB: loop body
LE: loop exit
PB: predicated region body
PF: predicated region fallthrough
CT: control target
= control target key end

     0   :  { %10 = vsyncpa [#allocation3], 0  ;;  %s1273_s0 = inlined_call_operand.hbm [shape: bf16[8,896], index: 0, kind: input, shape index: {}]   ;;  %s1274_s1 = inlined_call_operand.hbm [shape: bf16[896,128], index: 1, kind: input, shape index: {}]   ;;  %s1275_s2 = inlined_call_operand.vmem [shape: f32[1,128], index: 2, kind: input, shape index: {}]   ;;  %s1276_s3 = inlined_call_operand.hbm [shape: bf16[128,128], index: 3, kind: input, shape index: {}]   ;;  %s1277_s4 = inlined_call_operand.vmem [shape: f32[1,128], index: 4, kind: input, shape index: {}]   ;;  %s1278_s5 = inlined_call_operand.hbm [shape: f32[8,128], index: 5, kind: output, shape index: {}]  }
   0x1   :  { %11 = vsyncpa [#allocation6], 0 }
   0x2   :  { %12 = vsyncpa [#allocation4], 0  ;;  %s1197_s18 = smov [#allocation5]  }
   0x3   :  { %s28_s19 = sshll.u32 %s1197_s18, 4  ;;  %s29_s19 = int_to_ptr.vmem [resolvable:$true] %s28_s19 }
   0x4   :  { %s1119_s20 = scalar_lea.vmem %s29_s19, 7168  ;;  %p1124_p1 = scmp.lt.s32.totalorder %s29_s19, %s29_s19 }
   0x5   :  { %p1120_p0 = scmp.ne.s32.totalorder %s29_s19, %s1119_s20  ;;  %p1125_p2 = scmp.lt.s32.totalorder %s1119_s20, %s1119_s20 }
   0x7   :  { %p1126_p3 = por %p1125_p2, %p1124_p1 }
   0x9   :  { %p1127_p4 = pnand %p1126_p3, %p1120_p0 }
   0xb   :  { %1130 = shalt.err (!%p1127_p4)
}
   0xc   :  { %s1198_s21 = smov 64   ;;  %s1199_s22 = smov 4  }
   0xd   :  { %34 = dma.hbm_to_vmem [thread:$0]  %s1274_s1, 7168, %s29_s19, [#allocation6], %s1198_s21, %s1198_s21, %s1199_s22  }
   0xe   :  { %s1200_s25 = smov [#allocation2]   ;;  %s1201_s27 = smov [#allocation7]  }
   0xf   :  { %s19_s26 = sshll.u32 %s1200_s25, 4  ;;  %s42_s28 = sshll.u32 %s1201_s27, 4  ;;  %s20_s26 = int_to_ptr.vmem [resolvable:$true] %s19_s26  ;;  %s43_s28 = int_to_ptr.vmem [resolvable:$true] %s42_s28 }
  0x10   :  { %s1139_s29 = scalar_lea.vmem %s20_s26, 448  ;;  %p1144_p6 = scmp.lt.s32.totalorder %s20_s26, %s20_s26 }
  0x11   :  { %p1140_p5 = scmp.ne.s32.totalorder %s20_s26, %s1139_s29  ;;  %p1145_p7 = scmp.lt.s32.totalorder %s1139_s29, %s1139_s29 }
  0x13   :  { %p1146_p8 = por %p1145_p7, %p1144_p6 }
  0x15   :  { %p1147_p9 = pnand %p1146_p8, %p1140_p5 }
  0x17   :  { %1150 = shalt.err (!%p1147_p9)
}
  0x18   :  { %22 = dma.hbm_to_vmem [thread:$0]  %s1273_s0, 448, %s20_s26, [#allocation3]  }
  0x19   :  { %s1159_s7 = scalar_lea.vmem %s43_s28, 1024  ;;  %p1164_p11 = scmp.lt.s32.totalorder %s43_s28, %s43_s28 }
  0x1a   :  { %p1160_p10 = scmp.ne.s32.totalorder %s43_s28, %s1159_s7  ;;  %p1165_p12 = scmp.lt.s32.totalorder %s1159_s7, %s1159_s7 }
  0x1c   :  { %p1166_p13 = por %p1165_p12, %p1164_p11 }
  0x1e   :  { %p1167_p0 = pnand %p1166_p13, %p1160_p10 }
  0x20   :  { %1170 = shalt.err (!%p1167_p0)
}
  0x21   :  { %48 = dma.hbm_to_vmem [thread:$0]  %s1276_s3, 1024, %s43_s28, [#allocation6], %s1198_s21, %s1198_s21, %s1199_s22  }
  0x22   :  { %1191 = dma.done.wait [#allocation3], 448  }
  0x23   :  { %1192 = vsyncadd [#allocation3], 4294966848 }
  0x24   :  { %1193 = dma.done.wait [#allocation6], 8192  }
  0x25   :  { %1194 = vsyncadd [#allocation6], 4294959104  ;;  %v1040_v0 = vld [vmem:[#allocation5 + $0x78] sm:$0xff]   ;;  %v1044_v4 = vld [vmem:[#allocation5 + $0x70] sm:$0xff]   ;;  %v1202_v39 = vmov 0.0   ;;  %vm1203_vm0 = vmmov 0  }
  0x26   :  { %v1041_v1 = vld [vmem:[#allocation5 + $0xf8] sm:$0xff]   ;;  %908 = vmatprep.subr.bf16.mxu0 %v1040_v0  ;;  %v1045_v5 = vld [vmem:[#allocation5 + $0xf0] sm:$0xff]   ;;  %v1048_v8 = vld [vmem:[#allocation5 + $0x68] sm:$0xff]  }
  0x27   :  { %v1042_v2 = vld [vmem:[#allocation5 + $0x38] sm:$0xff]   ;;  %930 = vmatprep.subr.bf16.mxu1 %v1041_v1  ;;  %v1046_v6 = vld [vmem:[#allocation5 + $0x30] sm:$0xff]   ;;  %v1049_v9 = vld [vmem:[#allocation5 + $0xe8] sm:$0xff]  }
  0x28   :  { %v1043_v3 = vld [vmem:[#allocation5 + $0xb8] sm:$0xff]   ;;  %909 = vmatpush3.bf16.msra.mxu0 %v1042_v2  ;;  %v1047_v7 = vld [vmem:[#allocation5 + $0xb0] sm:$0xff]   ;;  %v1050_v10 = vld [vmem:[#allocation5 + $0x28] sm:$0xff]  }
  0x29   :  { %931 = vmatpush3.bf16.msra.mxu1 %v1043_v3  ;;  %910 = vmatprep.subr.bf16.mxu0 %v1044_v4  ;;  %v1051_v11 = vld [vmem:[#allocation5 + $0xa8] sm:$0xff]   ;;  %v1052_v12 = vld [vmem:[#allocation5 + $0x60] sm:$0xff]   ;;  %v1056_v16 = vld [vmem:[#allocation5 + $0x58] sm:$0xff]  }
  0x2a   :  { %932 = vmatprep.subr.bf16.mxu1 %v1045_v5  ;;  %v1053_v13 = vld [vmem:[#allocation5 + $0xe0] sm:$0xff]   ;;  %v1057_v17 = vld [vmem:[#allocation5 + $0xd8] sm:$0xff]   ;;  %v1060_v20 = vld [vmem:[#allocation5 + $0x50] sm:$0xff]  }
  0x2b   :  { %v1054_v14 = vld [vmem:[#allocation5 + $0x20] sm:$0xff]   ;;  %v1058_v18 = vld [vmem:[#allocation5 + $0x18] sm:$0xff]   ;;  %v1061_v21 = vld [vmem:[#allocation5 + $0xd0] sm:$0xff]  }
  0x2c   :  { %911 = vmatpush3.bf16.msra.mxu0 %v1046_v6  ;;  %v1055_v15 = vld [vmem:[#allocation5 + $0xa0] sm:$0xff]   ;;  %v1059_v19 = vld [vmem:[#allocation5 + $0x98] sm:$0xff]   ;;  %v1062_v22 = vld [vmem:[#allocation5 + $0x10] sm:$0xff]  }
  0x2d   :  { %933 = vmatpush3.bf16.msra.mxu1 %v1047_v7  ;;  %912 = vmatprep.subr.bf16.mxu0 %v1048_v8  ;;  %v1063_v23 = vld [vmem:[#allocation5 + $0x90] sm:$0xff]   ;;  %v1064_v24 = vld [vmem:[#allocation5 + $0x48] sm:$0xff]   ;;  %v1068_v28 = vld [vmem:[#allocation5 + $0x40] sm:$0xff]  }
  0x2e   :  { %934 = vmatprep.subr.bf16.mxu1 %v1049_v9  ;;  %v1065_v25 = vld [vmem:[#allocation5 + $0xc8] sm:$0xff]   ;;  %v1069_v29 = vld [vmem:[#allocation5 + $0xc0] sm:$0xff]   ;;  %v1076_v38 = vld [vmem:[#allocation5 + $0x178] sm:$0xff]  }
  0x2f   :  { %v1066_v26 = vld [vmem:[#allocation5 + $0x8] sm:$0xff]   ;;  %v1070_v30 = vld [vmem:[#allocation5] sm:$0xff]   ;;  %v1077_v40 = vld [vmem:[#allocation5 + $0x138] sm:$0xff]  }
  0x30   :  { %913 = vmatpush3.bf16.msra.mxu0 %v1050_v10  ;;  %v1067_v27 = vld [vmem:[#allocation5 + $0x88] sm:$0xff]   ;;  %v1071_v31 = vld [vmem:[#allocation5 + $0x80] sm:$0xff]   ;;  %v1078_v41 = vld [vmem:[#allocation5 + $0x1b8] sm:$0xff]  }
  0x31   :  { %935 = vmatpush3.bf16.msra.mxu1 %v1051_v11  ;;  %914 = vmatprep.subr.bf16.mxu0 %v1052_v12  ;;  %v61_v32 = vld [vmem:[#allocation2] sm:$0xff]  ;;  %v62_v33 = vld [vmem:[#allocation2 + $0x8] sm:$0xff]  ;;  %v1088_v51 = vld [vmem:[#allocation5 + $0x158] sm:$0xff]  }
  0x32   :  { %936 = vmatprep.subr.bf16.mxu1 %v1053_v13  ;;  %v836_v34 = vcombine.low %v61_v32, %v61_v32  ;;  %v837_v35 = vcombine.high %v61_v32, %v61_v32  ;;  %v838_v36 = vcombine.low %v62_v33, %v62_v33  ;;  %v839_v37 = vcombine.high %v62_v33, %v62_v33  ;;  %v1079_v42 = vld [vmem:[#allocation5 + $0x170] sm:$0xff]   ;;  %v1082_v45 = vld [vmem:[#allocation5 + $0x168] sm:$0xff]   ;;  %v1085_v48 = vld [vmem:[#allocation5 + $0x160] sm:$0xff]  }
  0x33   :  { %v1080_v43 = vld [vmem:[#allocation5 + $0x130] sm:$0xff]   ;;  %v1083_v46 = vld [vmem:[#allocation5 + $0x128] sm:$0xff]   ;;  %v1086_v49 = vld [vmem:[#allocation5 + $0x120] sm:$0xff]  }
  0x34   :  { %915 = vmatpush3.bf16.msra.mxu0 %v1054_v14  ;;  %577 = vmatprep.mubr.bf16.mxu0 %v837_v35  ;;  %v1081_v44 = vld [vmem:[#allocation5 + $0x1b0] sm:$0xff]   ;;  %v1084_v47 = vld [vmem:[#allocation5 + $0x1a8] sm:$0xff]   ;;  %v1087_v50 = vld [vmem:[#allocation5 + $0x1a0] sm:$0xff]  }
  0x35   :  { %937 = vmatpush3.bf16.msra.mxu1 %v1055_v15  ;;  %916 = vmatprep.subr.bf16.mxu0 %v1056_v16  ;;  %v1089_v52 = vld [vmem:[#allocation5 + $0x118] sm:$0xff]   ;;  %v1091_v54 = vld [vmem:[#allocation5 + $0x150] sm:$0xff]   ;;  %v1094_v57 = vld [vmem:[#allocation5 + $0x148] sm:$0xff]  }
  0x36   :  { %938 = vmatprep.subr.bf16.mxu1 %v1057_v17  ;;  %617 = vmatprep.mubr.bf16.mxu1 %v839_v37  ;;  %v1090_v53 = vld [vmem:[#allocation5 + $0x198] sm:$0xff]   ;;  %v1092_v55 = vld [vmem:[#allocation5 + $0x110] sm:$0xff]   ;;  %v1095_v58 = vld [vmem:[#allocation5 + $0x108] sm:$0xff]  }
  0x37   :  { %v1093_v56 = vld [vmem:[#allocation5 + $0x190] sm:$0xff]   ;;  %v1096_v59 = vld [vmem:[#allocation5 + $0x188] sm:$0xff]   ;;  %v1097_v61 = vld [vmem:[#allocation5 + $0x140] sm:$0xff]  }
  0x38   :  { %917 = vmatpush3.bf16.msra.mxu0 %v1058_v18  ;;  %v63_v60 = vld [vmem:[#allocation2 + $0x10] sm:$0xff]  ;;  %v1098_v63 = vld [vmem:[#allocation5 + $0x100] sm:$0xff]   ;;  %v1102_v2 = vld [vmem:[#allocation2 + $0x18] ss:$0 sps:$4 sm:$0xff]  }
  0x39   :  { %939 = vmatpush3.bf16.msra.mxu1 %v1059_v19  ;;  %918 = vmatprep.subr.bf16.mxu0 %v1060_v20  ;;  %v841_v62 = vcombine.high %v63_v60, %v63_v60  ;;  %v1099_v0 = vld [vmem:[#allocation5 + $0x180] sm:$0xff]   ;;  %v840_v1 = vcombine.low %v63_v60, %v63_v60  ;;  %v1103_v3 = vld [vmem:[#allocation7 + $0x38] sm:$0xff]   ;;  %v1104_v4 = vld [vmem:[#allocation7 + $0x30] sm:$0xff]  }
  0x3a   :  { %940 = vmatprep.subr.bf16.mxu1 %v1061_v21  ;;  %v1105_v5 = vld [vmem:[#allocation7 + $0x28] sm:$0xff]   ;;  %v1106_v6 = vld [vmem:[#allocation7 + $0x20] sm:$0xff]   ;;  %v1107_v7 = vld [vmem:[#allocation7 + $0x18] sm:$0xff]  }
  0x3b   :  { %v1108_v8 = vld [vmem:[#allocation7 + $0x10] sm:$0xff]   ;;  %v1109_v9 = vld [vmem:[#allocation7 + $0x8] sm:$0xff]   ;;  %v1110_v10 = vld [vmem:[#allocation7] sm:$0xff]  }
  0x3c   :  { %919 = vmatpush3.bf16.msra.mxu0 %v1062_v22  ;;  %v835_v20 = vld [vmem:[%s1275_s2] ss:$0 sm:$0xff]  ;;  %s1204_s2 = smov [#allocation8]  }
  0x3d   :  { %941 = vmatpush3.bf16.msra.mxu1 %v1063_v23  ;;  %920 = vmatprep.subr.bf16.mxu0 %v1064_v24  ;;  %v899_v37 = vld [vmem:[%s1277_s4] ss:$0 sm:$0xff]  ;;  %s825_s11 = sshll.u32 %s1204_s2, 4  ;;  %s826_s11 = int_to_ptr.vmem [resolvable:$true] %s825_s11 }
  0x3e   :  { %942 = vmatprep.subr.bf16.mxu1 %v1065_v25  ;;  %s1171_s12 = scalar_lea.vmem %s826_s11, 128  ;;  %p1176_p2 = scmp.lt.s32.totalorder %s826_s11, %s826_s11 }
  0x3f   :  { %p1172_p1 = scmp.ne.s32.totalorder %s826_s11, %s1171_s12  ;;  %p1177_p3 = scmp.lt.s32.totalorder %s1171_s12, %s1171_s12 }
  0x40   :  { %921 = vmatpush3.bf16.msra.mxu0 %v1066_v26 }
  0x41   :  { %943 = vmatpush3.bf16.msra.mxu1 %v1067_v27  ;;  %922 = vmatprep.subr.bf16.mxu0 %v1068_v28  ;;  %p1178_p4 = por %p1177_p3, %p1176_p2 }
  0x42   :  { %944 = vmatprep.subr.bf16.mxu1 %v1069_v29 }
  0x43   :  { %p1179_p5 = pnand %p1178_p4, %p1172_p1 }
  0x44   :  { %923 = vmatpush3.bf16.msra.mxu0 %v1070_v30 }
  0x45   :  { %945 = vmatpush3.bf16.msra.mxu1 %v1071_v31  ;;  %952 = vmatprep.subr.bf16.mxu0 %v1076_v38 }
  0x46   :  { %992 = vmatprep.subr.bf16.mxu1 %v1202_v39 }
  0x47   :  { %578 = vmatmul.mubr.bf16.vlgmr.msra.gmra.mxu0 %v836_v34 }
  0x48   :  { %618 = vmatmul.mubr.bf16.vlgmr.msra.gmra.mxu1 %v838_v36  ;;  %953 = vmatpush3.bf16.msra.mxu0 %v1077_v40 }
  0x49   :  { %993 = vmatpush3.bf16.msra.mxu1 %v1078_v41  ;;  %954 = vmatprep.subr.bf16.mxu0 %v1079_v42 }
  0x4a   :  { %994 = vmatprep.subr.bf16.mxu1 %v1202_v39  ;;  %1008 = vmatprep.mubr.msk.bf16.mxu1 %vm1203_vm0, %v1202_v39 }
  0x4b   :  { %657 = vmatprep.mubr.bf16.mxu0 %v841_v62 }
  0x4c   :  { %955 = vmatpush3.bf16.msra.mxu0 %v1080_v43 }
  0x4d   :  { %995 = vmatpush3.bf16.msra.mxu1 %v1081_v44  ;;  %956 = vmatprep.subr.bf16.mxu0 %v1082_v45 }
  0x4e   :  { %996 = vmatprep.subr.bf16.mxu1 %v1202_v39 }
  0x50   :  { %957 = vmatpush3.bf16.msra.mxu0 %v1083_v46 }
  0x51   :  { %997 = vmatpush3.bf16.msra.mxu1 %v1084_v47  ;;  %958 = vmatprep.subr.bf16.mxu0 %v1085_v48 }
  0x52   :  { %998 = vmatprep.subr.bf16.mxu1 %v1202_v39 }
  0x54   :  { %959 = vmatpush3.bf16.msra.mxu0 %v1086_v49 }
  0x55   :  { %999 = vmatpush3.bf16.msra.mxu1 %v1087_v50  ;;  %960 = vmatprep.subr.bf16.mxu0 %v1088_v51 }
  0x56   :  { %1000 = vmatprep.subr.bf16.mxu1 %v1202_v39 }
  0x58   :  { %961 = vmatpush3.bf16.msra.mxu0 %v1089_v52 }
  0x59   :  { %1001 = vmatpush3.bf16.msra.mxu1 %v1090_v53  ;;  %962 = vmatprep.subr.bf16.mxu0 %v1091_v54 }
  0x5a   :  { %1002 = vmatprep.subr.bf16.mxu1 %v1202_v39 }
  0x5c   :  { %963 = vmatpush3.bf16.msra.mxu0 %v1092_v55 }
  0x5d   :  { %1003 = vmatpush3.bf16.msra.mxu1 %v1093_v56  ;;  %964 = vmatprep.subr.bf16.mxu0 %v1094_v57 }
  0x5e   :  { %1004 = vmatprep.subr.bf16.mxu1 %v1202_v39 }
  0x60   :  { %965 = vmatpush3.bf16.msra.mxu0 %v1095_v58 }
  0x61   :  { %1005 = vmatpush3.bf16.msra.mxu1 %v1096_v59  ;;  %966 = vmatprep.subr.bf16.mxu0 %v1097_v61 }
  0x62   :  { %1006 = vmatprep.subr.bf16.mxu1 %v1202_v39 }
  0x64   :  { %967 = vmatpush3.bf16.msra.mxu0 %v1098_v63 }
  0x65   :  { %1007 = vmatpush3.bf16.msra.mxu1 %v1099_v0  ;;  %1012 = vmatprep.subr.bf16.mxu0 %v1202_v39 }
  0x67   :  { %658 = vmatmul.mubr.bf16.vlgmr.msra.gmra.mxu0 %v840_v1 }
  0x68   :  { %1009 = vmatmul.mubr.bf16.vlgmr.msra.gmra.mxu1 %v1102_v2  ;;  %1028 = vmatprep.mubr.msk.bf16.mxu0 %vm1203_vm0, %v1202_v39 }
  0x69   :  { %1013 = vmatpush3.bf16.msra.mxu0 %v1103_v3 }
  0x6a   :  { %1014 = vmatprep.subr.bf16.mxu0 %v1202_v39 }
  0x6d   :  { %1015 = vmatpush3.bf16.msra.mxu0 %v1104_v4 }
  0x6e   :  { %1016 = vmatprep.subr.bf16.mxu0 %v1202_v39 }
  0x71   :  { %1017 = vmatpush3.bf16.msra.mxu0 %v1105_v5 }
  0x72   :  { %1018 = vmatprep.subr.bf16.mxu0 %v1202_v39 }
  0x75   :  { %1019 = vmatpush3.bf16.msra.mxu0 %v1106_v6 }
  0x76   :  { %1020 = vmatprep.subr.bf16.mxu0 %v1202_v39 }
  0x79   :  { %1021 = vmatpush3.bf16.msra.mxu0 %v1107_v7 }
  0x7a   :  { %1022 = vmatprep.subr.bf16.mxu0 %v1202_v39 }
  0x7d   :  { %1023 = vmatpush3.bf16.msra.mxu0 %v1108_v8 }
  0x7e   :  { %1024 = vmatprep.subr.bf16.mxu0 %v1202_v39 }
  0x81   :  { %1025 = vmatpush3.bf16.msra.mxu0 %v1109_v9 }
  0x82   :  { %1026 = vmatprep.subr.bf16.mxu0 %v1202_v39 }
  0x85   :  { %1027 = vmatpush3.bf16.msra.mxu0 %v1110_v10 }
 0x107   :  { %v924_v11 = vpop.f32.mrf.mxu0 }
 0x108   :  { %v946_v12 = vpop.f32.mrf.mxu1 }
 0x109   :  { %v925_v13 = vpop.f32.mrf.mxu0 }
 0x10a   :  { %v947_v14 = vpop.f32.mrf.mxu1  ;;  %v926_v19 = vadd.f32 %v925_v13, %v924_v11 }
 0x10b   :  { %v927_v15 = vpop.f32.mrf.mxu0  ;;  %v948_v22 = vadd.f32 %v947_v14, %v946_v12 }
 0x10c   :  { %v949_v16 = vpop.f32.mrf.mxu1  ;;  %v580_v21 = vadd.f32 %v926_v19, %v835_v20 }
 0x10d   :  { %v928_v17 = vpop.f32.mrf.mxu0 }
 0x10e   :  { %v950_v18 = vpop.f32.mrf.mxu1  ;;  %v620_v26 = vadd.f32 %v948_v22, %v580_v21 }
 0x127   :  { %v968_v23 = vpop.f32.mrf.mxu0 }
 0x128   :  { %v699_v24 = vpop.f32.mrf.mxu1 }
 0x129   :  { %v969_v25 = vpop.f32.mrf.mxu0 }
 0x12a   :  { %v970_v27 = vadd.f32 %v969_v25, %v968_v23  ;;  %v1010_v28 = vpop.f32.mrf.mxu1 }
 0x12b   :  { %v971_v29 = vpop.f32.mrf.mxu0 }
 0x12c   :  { %v660_v30 = vadd.f32 %v970_v27, %v620_v26  ;;  %v702_v31 = vpop.f32.mrf.mxu1 }
 0x12d   :  { %v972_v32 = vpop.f32.mrf.mxu0 }
 0x12e   :  { %v700_v33 = vadd.f32 %v699_v24, %v660_v30  ;;  %v1011_v34 = vpop.f32.mrf.mxu1 }
 0x130   :  { %v705_v35 = vmax.f32 %v700_v33, 0.0 }
 0x132   :  { %v706_v36 = vpack.c.bf16 %v705_v35, %v705_v35 }
 0x134   :  { %1029 = vmatmul.mubr.bf16.vlgmr.msra.gmra.mxu0 %v706_v36 }
 0x1f4   :  { %v812_v38 = vpop.f32.mrf.mxu0 }
 0x1f5   :  { %v813_v39 = vadd.f32 %v899_v37, %v812_v38 }
 0x1f6   :  { %v1030_v40 = vpop.f32.mrf.mxu0 }
 0x1f7   :  { %818 = vst [vmem:[#allocation8] sm:$0xff] %v813_v39 }
 0x1f8   :  { %v815_v41 = vpop.f32.mrf.mxu0 }
 0x1f9   :  { %1182 = shalt.err (!%p1179_p5)
}
 0x1fa   :  { %828 = dma.vmem_to_hbm [thread:$0]  %s826_s11, 128, %s1278_s5, [#allocation4]   ;;  %v1031_v42 = vpop.f32.mrf.mxu0 }
 0x1fb   :  { %1195 = dma.done.wait [#allocation4], 128  }
 0x1fc   :  { %1196 = vsyncadd [#allocation4], 4294967168 }
 0x1fd   :  { %832 = vsyncpa [#allocation3], 1 }
 0x1fe   :  { %833 = vsyncpa [#allocation6], 1 }
 0x1ff   :  { %834 = vsyncpa [#allocation4], 1 }

</bundles_post_ra>
